<compile_context>
chip_gen: v7x
topology: tpu7x:2x2x1
jax: 0.10.0
libtpu: 0.0.40
codegen_flags: <defaults>
</compile_context>

<pallas_src>
import jax
import jax.numpy as jnp
from jax.experimental import pallas as pl
from jax.experimental.pallas import tpu as pltpu

IN_FEATURES = 33 * 3          # 99
LAYER_DIMS = [IN_FEATURES, 64, 64, 32, 16, 1]
LEAKY_SLOPE = 0.2
BN_EPS = 1e-5
MAX_TILE_B = 2048             # rows per grid step (multiple of 256)


def _round_up(x, m):
    return ((x + m - 1) // m) * m


def _choose_tile_b(B):
    """Batch tile size: full batch when small, else large tiles but >= 2 of them."""
    if B <= 256:
        return B                                   # single full-array tile
    return min(MAX_TILE_B, _round_up((B + 1) // 2, 256))


def _linear_lrelu(h, w, b):
    """y = LeakyReLU(h @ w + b); bf16 MXU operands, f32 accumulation/elementwise."""
    y = jnp.dot(h.astype(jnp.bfloat16), w, preferred_element_type=jnp.float32) + b
    return jnp.maximum(y, LEAKY_SLOPE * y)


def mlp_kernel(x_ref, w1_ref, w2_ref, w3_ref, w4_ref, w5_ref, bias_ref, o_ref):
    """Full (BN-folded) GoodBadMLP forward for one batch tile.

    x_ref:    (TILE_B, 99)   f32 input rows (streams via the grid)
    w1..w4:   (in, out)      bf16 BN-folded weights (VMEM resident)
    w5_ref:   (1, 16)        bf16 final-layer weight row (pre-transposed)
    bias_ref: (8, 128)       f32 packed folded biases, rows 0..4 used
    o_ref:    (1, 1, TILE_B) lane-dense output slab for this tile
    """
    biases = bias_ref[...]                                   # (8, 128) f32
    h = x_ref[...]                                           # (TILE_B, 99) f32
    h = _linear_lrelu(h, w1_ref[...], biases[0:1, 0:64])
    h = _linear_lrelu(h, w2_ref[...], biases[1:2, 0:64])
    h = _linear_lrelu(h, w3_ref[...], biases[2:3, 0:32])
    h = _linear_lrelu(h, w4_ref[...], biases[3:4, 0:16])
    # Final Linear(16, 1) as a lane-dense (1,16) x (TILE_B,16)^T contraction.
    res = jax.lax.dot_general(
        w5_ref[...], h.astype(jnp.bfloat16),
        (((1,), (1,)), ((), ())),
        preferred_element_type=jnp.float32)                  # (1, TILE_B) f32
    o_ref[...] = jnp.reshape(res + biases[4:5, 0:1], o_ref.shape)


def init_params(key):
    """Deterministic synthetic parameters matching the PyTorch module's shapes.

    Linear weights are stored pre-transposed as (in, out); BN params as (1, N).
    """
    params = []
    n_hidden = len(LAYER_DIMS) - 2  # 4 hidden (Linear+BN+LeakyReLU) blocks
    keys = jax.random.split(key, (n_hidden + 1) * 2 + n_hidden * 4)
    k = iter(keys)
    for li in range(len(LAYER_DIMS) - 1):
        fan_in, fan_out = LAYER_DIMS[li], LAYER_DIMS[li + 1]
        bound = 1.0 / jnp.sqrt(fan_in)
        w = jax.random.uniform(next(k), (fan_in, fan_out), jnp.float32, -bound, bound)
        b = jax.random.uniform(next(k), (1, fan_out), jnp.float32, -bound, bound)
        params.extend([w, b])
        if li < n_hidden:  # BatchNorm1d after every hidden Linear
            gamma = 1.0 + 0.1 * jax.random.normal(next(k), (1, fan_out), jnp.float32)
            beta = 0.1 * jax.random.normal(next(k), (1, fan_out), jnp.float32)
            rmean = 0.1 * jax.random.normal(next(k), (1, fan_out), jnp.float32)
            rvar = jnp.abs(jax.random.normal(next(k), (1, fan_out), jnp.float32)) + 0.5
            params.extend([gamma, beta, rmean, rvar])
    return params


def _fold_and_pack(params):
    """Fold eval-mode BN into the preceding Linear; bf16 weights; pack biases."""
    ws = []
    bias_pack = jnp.zeros((8, 128), jnp.float32)
    i = 0
    for li in range(4):
        w, b, g, be, m, v = params[i:i + 6]
        i += 6
        scale = g * jax.lax.rsqrt(v + BN_EPS)                  # (1, out)
        ws.append((w * scale).astype(jnp.bfloat16))            # (in, out) bf16
        b_f = (b - m) * scale + be                             # (1, out) f32
        bias_pack = bias_pack.at[li, :b_f.shape[1]].set(b_f[0])
    w5, b5 = params[i], params[i + 1]                          # (16, 1), (1, 1)
    ws.append(jnp.transpose(w5).astype(jnp.bfloat16))          # (1, 16) bf16
    bias_pack = bias_pack.at[4, :1].set(b5[0])
    return ws, bias_pack


def good_bad_mlp_forward(x, params):
    """x: (B, 33, 3) float32 -> (B,) float32 (matches output.view(-1))."""
    B = x.shape[0]
    x2 = x.reshape(B, IN_FEATURES).astype(jnp.float32)   # nn.Flatten
    ws, bias_pack = _fold_and_pack(params)

    tile_b = _choose_tile_b(B)
    num_tiles = pl.cdiv(B, tile_b)

    w_specs = [pl.BlockSpec(w.shape, lambda i: (0, 0)) for w in ws]   # resident
    out = pl.pallas_call(
        mlp_kernel,
        out_shape=jax.ShapeDtypeStruct((num_tiles, 1, tile_b), jnp.float32),
        grid=(num_tiles,),
        in_specs=([pl.BlockSpec((tile_b, IN_FEATURES), lambda i: (i, 0))]  # x streams
                  + w_specs
                  + [pl.BlockSpec((8, 128), lambda i: (0, 0))]),           # biases
        out_specs=pl.BlockSpec((1, 1, tile_b), lambda i: (i, 0, 0)),       # lane-dense
        compiler_params=pltpu.CompilerParams(
            dimension_semantics=("parallel",)),
    )(x2, *ws, bias_pack)
    # Flatten lane-dense tiles back to per-row order; drop tail padding rows.
    return out.reshape(-1)[:B]


def reference_forward(x, params):
    """Pure-JAX f32 reference (unfused Linear + BN(eval) + LeakyReLU)."""
    B = x.shape[0]
    h = x.reshape(B, IN_FEATURES).astype(jnp.float32)
    i = 0
    for _ in range(4):
        w, b, g, be, m, v = params[i:i + 6]
        i += 6
        h = h @ w + b
        h = (h - m) * jax.lax.rsqrt(v + BN_EPS) * g + be
        h = jnp.where(h > 0, h, LEAKY_SLOPE * h)
    w5, b5 = params[i:i + 2]
    return (h @ w5 + b5).reshape(-1)


if __name__ == "__main__":
    key = jax.random.PRNGKey(0)
    k_param, k_x, k_x2 = jax.random.split(key, 3)
    params = init_params(k_param)

    # Small demo batch (single full-array tile).
    B = 8
    x = jax.random.normal(k_x, (B, 33, 3), jnp.float32)
    out = jax.block_until_ready(good_bad_mlp_forward(x, params))
    ref = reference_forward(x, params)
    assert out.shape == (B,)
    # bf16 MXU operands -> looser tolerance than the pure-f32 reference.
    assert jnp.allclose(out, ref, atol=3e-2, rtol=3e-2), (out, ref)

    # Larger batch: exercises the streaming batch grid (2 tiles, partial tail).
    B2 = 600
    xl = jax.random.normal(k_x2, (B2, 33, 3), jnp.float32)
    out2 = jax.block_until_ready(good_bad_mlp_forward(xl, params))
    ref2 = reference_forward(xl, params)
    assert out2.shape == (B2,)
    assert jnp.allclose(out2, ref2, atol=3e-2, rtol=3e-2)

    print("KERNEL_OK")
</pallas_src>

<mosaic_0001>
module attributes {stable_mosaic.version = 11 : i64} {
  func.func @mlp_kernel(%arg0: i32, %arg1: memref<8x99xf32, #tpu.memory_space<vmem>>, %arg2: memref<99x64xbf16, #tpu.memory_space<vmem>>, %arg3: memref<64x64xbf16, #tpu.memory_space<vmem>>, %arg4: memref<64x32xbf16, #tpu.memory_space<vmem>>, %arg5: memref<32x16xbf16, #tpu.memory_space<vmem>>, %arg6: memref<1x16xbf16, #tpu.memory_space<vmem>>, %arg7: memref<8x128xf32, #tpu.memory_space<vmem>>, %arg8: memref<1x1x8xf32, #tpu.memory_space<vmem>>) attributes {dimension_semantics = [#tpu.dimension_semantics<parallel>], iteration_bounds = array<i64: 1>, scalar_prefetch = 0 : i64, scratch_operands = 0 : i64, tpu.core_type = #tpu.core_type<tc>, window_params = [{transform_indices = @transform_0, window_bounds = array<i64: 8, 99>}, {pipeline_mode = #tpu.pipeline_mode<synchronous>, transform_indices = @transform_1, window_bounds = array<i64: 99, 64>}, {pipeline_mode = #tpu.pipeline_mode<synchronous>, transform_indices = @transform_2, window_bounds = array<i64: 64, 64>}, {pipeline_mode = #tpu.pipeline_mode<synchronous>, transform_indices = @transform_3, window_bounds = array<i64: 64, 32>}, {pipeline_mode = #tpu.pipeline_mode<synchronous>, transform_indices = @transform_4, window_bounds = array<i64: 32, 16>}, {pipeline_mode = #tpu.pipeline_mode<synchronous>, transform_indices = @transform_5, window_bounds = array<i64: 1, 16>}, {pipeline_mode = #tpu.pipeline_mode<synchronous>, transform_indices = @transform_6, window_bounds = array<i64: 8, 128>}, {transform_indices = @transform_7, window_bounds = array<i64: 1, 1, 8>}]} {
    %c0 = arith.constant 0 : index
    %c0_0 = arith.constant 0 : index
    %0 = vector.load %arg7[%c0, %c0_0] : memref<8x128xf32, #tpu.memory_space<vmem>>, vector<8x128xf32>
    %c0_1 = arith.constant 0 : index
    %c0_2 = arith.constant 0 : index
    %1 = vector.load %arg1[%c0_1, %c0_2] : memref<8x99xf32, #tpu.memory_space<vmem>>, vector<8x99xf32>
    %c0_3 = arith.constant 0 : index
    %c0_4 = arith.constant 0 : index
    %2 = vector.load %arg2[%c0_3, %c0_4] : memref<99x64xbf16, #tpu.memory_space<vmem>>, vector<99x64xbf16>
    %3 = vector.extract_strided_slice %0 {offsets = [0, 0], sizes = [1, 64], strides = [1, 1]} : vector<8x128xf32> to vector<1x64xf32>
    %4 = arith.truncf %1 : vector<8x99xf32> to vector<8x99xbf16>
    %cst = arith.constant dense<0.000000e+00> : vector<8x64xf32>
    %5 = tpu.matmul %4, %2, %cst {dimension_numbers = #tpu.dot_dimension_numbers<[1], [0], [0], [1], [0, 0, 1, 1], [], []>} : vector<8x99xbf16>, vector<99x64xbf16>, vector<8x64xf32> -> vector<8x64xf32>
    %6 = vector.broadcast %3 : vector<1x64xf32> to vector<8x64xf32>
    %7 = arith.addf %5, %6 : vector<8x64xf32>
    %cst_5 = arith.constant 2.000000e-01 : f32
    %8 = vector.broadcast %cst_5 : f32 to vector<8x64xf32>
    %9 = arith.mulf %8, %7 : vector<8x64xf32>
    %10 = arith.maximumf %7, %9 : vector<8x64xf32>
    %c0_6 = arith.constant 0 : index
    %c0_7 = arith.constant 0 : index
    %11 = vector.load %arg3[%c0_6, %c0_7] : memref<64x64xbf16, #tpu.memory_space<vmem>>, vector<64x64xbf16>
    %12 = vector.extract_strided_slice %0 {offsets = [1, 0], sizes = [1, 64], strides = [1, 1]} : vector<8x128xf32> to vector<1x64xf32>
    %13 = arith.truncf %10 : vector<8x64xf32> to vector<8x64xbf16>
    %cst_8 = arith.constant dense<0.000000e+00> : vector<8x64xf32>
    %14 = tpu.matmul %13, %11, %cst_8 {dimension_numbers = #tpu.dot_dimension_numbers<[1], [0], [0], [1], [0, 0, 1, 1], [], []>} : vector<8x64xbf16>, vector<64x64xbf16>, vector<8x64xf32> -> vector<8x64xf32>
    %15 = vector.broadcast %12 : vector<1x64xf32> to vector<8x64xf32>
    %16 = arith.addf %14, %15 : vector<8x64xf32>
    %cst_9 = arith.constant 2.000000e-01 : f32
    %17 = vector.broadcast %cst_9 : f32 to vector<8x64xf32>
    %18 = arith.mulf %17, %16 : vector<8x64xf32>
    %19 = arith.maximumf %16, %18 : vector<8x64xf32>
    %c0_10 = arith.constant 0 : index
    %c0_11 = arith.constant 0 : index
    %20 = vector.load %arg4[%c0_10, %c0_11] : memref<64x32xbf16, #tpu.memory_space<vmem>>, vector<64x32xbf16>
    %21 = vector.extract_strided_slice %0 {offsets = [2, 0], sizes = [1, 32], strides = [1, 1]} : vector<8x128xf32> to vector<1x32xf32>
    %22 = arith.truncf %19 : vector<8x64xf32> to vector<8x64xbf16>
    %cst_12 = arith.constant dense<0.000000e+00> : vector<8x32xf32>
    %23 = tpu.matmul %22, %20, %cst_12 {dimension_numbers = #tpu.dot_dimension_numbers<[1], [0], [0], [1], [0, 0, 1, 1], [], []>} : vector<8x64xbf16>, vector<64x32xbf16>, vector<8x32xf32> -> vector<8x32xf32>
    %24 = vector.broadcast %21 : vector<1x32xf32> to vector<8x32xf32>
    %25 = arith.addf %23, %24 : vector<8x32xf32>
    %cst_13 = arith.constant 2.000000e-01 : f32
    %26 = vector.broadcast %cst_13 : f32 to vector<8x32xf32>
    %27 = arith.mulf %26, %25 : vector<8x32xf32>
    %28 = arith.maximumf %25, %27 : vector<8x32xf32>
    %c0_14 = arith.constant 0 : index
    %c0_15 = arith.constant 0 : index
    %29 = vector.load %arg5[%c0_14, %c0_15] : memref<32x16xbf16, #tpu.memory_space<vmem>>, vector<32x16xbf16>
    %30 = vector.extract_strided_slice %0 {offsets = [3, 0], sizes = [1, 16], strides = [1, 1]} : vector<8x128xf32> to vector<1x16xf32>
    %31 = arith.truncf %28 : vector<8x32xf32> to vector<8x32xbf16>
    %cst_16 = arith.constant dense<0.000000e+00> : vector<8x16xf32>
    %32 = tpu.matmul %31, %29, %cst_16 {dimension_numbers = #tpu.dot_dimension_numbers<[1], [0], [0], [1], [0, 0, 1, 1], [], []>} : vector<8x32xbf16>, vector<32x16xbf16>, vector<8x16xf32> -> vector<8x16xf32>
    %33 = vector.broadcast %30 : vector<1x16xf32> to vector<8x16xf32>
    %34 = arith.addf %32, %33 : vector<8x16xf32>
    %cst_17 = arith.constant 2.000000e-01 : f32
    %35 = vector.broadcast %cst_17 : f32 to vector<8x16xf32>
    %36 = arith.mulf %35, %34 : vector<8x16xf32>
    %37 = arith.maximumf %34, %36 : vector<8x16xf32>
    %c0_18 = arith.constant 0 : index
    %c0_19 = arith.constant 0 : index
    %38 = vector.load %arg6[%c0_18, %c0_19] : memref<1x16xbf16, #tpu.memory_space<vmem>>, vector<1x16xbf16>
    %39 = arith.truncf %37 : vector<8x16xf32> to vector<8x16xbf16>
    %cst_20 = arith.constant dense<0.000000e+00> : vector<1x8xf32>
    %40 = tpu.matmul %38, %39, %cst_20 {dimension_numbers = #tpu.dot_dimension_numbers<[1], [1], [0], [0], [0, 0, 1, 0], [], []>} : vector<1x16xbf16>, vector<8x16xbf16>, vector<1x8xf32> -> vector<1x8xf32>
    %41 = vector.extract_strided_slice %0 {offsets = [4, 0], sizes = [1, 1], strides = [1, 1]} : vector<8x128xf32> to vector<1x1xf32>
    %42 = vector.broadcast %41 : vector<1x1xf32> to vector<1x8xf32>
    %43 = arith.addf %40, %42 : vector<1x8xf32>
    %44 = vector.shape_cast %43 : vector<1x8xf32> to vector<1x1x8xf32>
    %c0_21 = arith.constant 0 : index
    %c0_22 = arith.constant 0 : index
    %c0_23 = arith.constant 0 : index
    %45 = vector.load %arg8[%c0_21, %c0_22, %c0_23] : memref<1x1x8xf32, #tpu.memory_space<vmem>>, vector<1x1x8xf32>
    tpu.vector_store %arg8[%c0_21, %c0_22, %c0_23], %44 {strides = array<i32>} : memref<1x1x8xf32, #tpu.memory_space<vmem>>, vector<1x1x8xf32>,
    return
  }
  func.func @transform_0(%arg0: i32) -> (i32, i32) {
    %c0_i32 = arith.constant 0 : i32
    %c0_i32_0 = arith.constant 0 : i32
    return %arg0, %c0_i32 : i32, i32
  }
  func.func @transform_1(%arg0: i32) -> (i32, i32) {
    %c0_i32 = arith.constant 0 : i32
    %c0_i32_0 = arith.constant 0 : i32
    %c0_i32_1 = arith.constant 0 : i32
    return %c0_i32, %c0_i32_0 : i32, i32
  }
  func.func @transform_2(%arg0: i32) -> (i32, i32) {
    %c0_i32 = arith.constant 0 : i32
    %c0_i32_0 = arith.constant 0 : i32
    %c0_i32_1 = arith.constant 0 : i32
    return %c0_i32, %c0_i32_0 : i32, i32
  }
  func.func @transform_3(%arg0: i32) -> (i32, i32) {
    %c0_i32 = arith.constant 0 : i32
    %c0_i32_0 = arith.constant 0 : i32
    %c0_i32_1 = arith.constant 0 : i32
    return %c0_i32, %c0_i32_0 : i32, i32
  }
  func.func @transform_4(%arg0: i32) -> (i32, i32) {
    %c0_i32 = arith.constant 0 : i32
    %c0_i32_0 = arith.constant 0 : i32
    %c0_i32_1 = arith.constant 0 : i32
    return %c0_i32, %c0_i32_0 : i32, i32
  }
  func.func @transform_5(%arg0: i32) -> (i32, i32) {
    %c0_i32 = arith.constant 0 : i32
    %c0_i32_0 = arith.constant 0 : i32
    %c0_i32_1 = arith.constant 0 : i32
    return %c0_i32, %c0_i32_0 : i32, i32
  }
  func.func @transform_6(%arg0: i32) -> (i32, i32) {
    %c0_i32 = arith.constant 0 : i32
    %c0_i32_0 = arith.constant 0 : i32
    %c0_i32_1 = arith.constant 0 : i32
    return %c0_i32, %c0_i32_0 : i32, i32
  }
  func.func @transform_7(%arg0: i32) -> (i32, i32, i32) {
    %c0_i32 = arith.constant 0 : i32
    %c0_i32_0 = arith.constant 0 : i32
    %c0_i32_1 = arith.constant 0 : i32
    return %arg0, %c0_i32, %c0_i32_0 : i32, i32, i32
  }
}

</mosaic_0001>

<bundles_post_ra>
// kernel: tpu_custom_call.1
= control target key start
LH: loop header
LB: loop body
LE: loop exit
PB: predicated region body
PF: predicated region fallthrough
CT: control target
= control target key end

     0   :  { %v591_v1 = vmov 0.0   ;;  %vm592_vm0 = vmmov 0   ;;  %vm91_vm1 = vcmask 1040384   ;;  %s738_s0 = inlined_call_operand.vmem [shape: f32[8,99], index: 0, kind: input, shape index: {}]   ;;  %s739_s1 = inlined_call_operand.vmem [shape: bf16[99,64], index: 1, kind: input, shape index: {}]   ;;  %s740_s2 = inlined_call_operand.vmem [shape: bf16[64,64], index: 2, kind: input, shape index: {}]   ;;  %s741_s3 = inlined_call_operand.vmem [shape: bf16[64,32], index: 3, kind: input, shape index: {}]   ;;  %s742_s4 = inlined_call_operand.vmem [shape: bf16[32,16], index: 4, kind: input, shape index: {}]   ;;  %s743_s5 = inlined_call_operand.vmem [shape: bf16[1,16], index: 5, kind: input, shape index: {}]   ;;  %s744_s6 = inlined_call_operand.vmem [shape: f32[8,128], index: 6, kind: input, shape index: {}]   ;;  %s745_s7 = inlined_call_operand.hbm [shape: f32[1,1,8], index: 7, kind: output, shape index: {}]  }
   0x1   :  { %v550_v0 = vld [vmem:[%s739_s1] sm:$0xff]   ;;  %488 = vmatprep.subr.bf16.mxu0 %v591_v1  ;;  %506 = vmatprep.subr.bf16.mxu1 %v591_v1  ;;  %v551_v2 = vld [vmem:[%s739_s1 + $0x8] sm:$0xff]   ;;  %v552_v3 = vld [vmem:[%s739_s1 + $0x10] sm:$0xff]  }
   0x2   :  { %489 = vmatpush3.bf16.msra.mxu0 %v550_v0  ;;  %502 = vmatprep.mubr.msk.bf16.mxu0 %vm592_vm0, %v591_v1  ;;  %v557_v4 = vld [vmem:[%s740_s2] sm:$0xff]   ;;  %v553_v5 = vld [vmem:[%s739_s1 + $0x18] sm:$0xff]   ;;  %v558_v6 = vld [vmem:[%s740_s2 + $0x8] sm:$0xff]  }
   0x3   :  { %490 = vmatprep.subr.bf16.mxu0 %v591_v1  ;;  %514 = vmatprep.mubr.msk.bf16.mxu1 %vm592_vm0, %v591_v1  ;;  %v554_v7 = vld [vmem:[%s739_s1 + $0x20] sm:$0xff]  }
   0x4   :  { %507 = vmatpush3.bf16.msra.mxu1 %v557_v4 }
   0x5   :  { %508 = vmatprep.subr.bf16.mxu1 %v591_v1 }
   0x6   :  { %491 = vmatpush3.bf16.msra.mxu0 %v551_v2 }
   0x7   :  { %492 = vmatprep.subr.bf16.mxu0 %v591_v1 }
   0x8   :  { %509 = vmatpush3.bf16.msra.mxu1 %v558_v6 }
   0x9   :  { %510 = vmatprep.subr.bf16.mxu1 %v591_v1 }
   0xa   :  { %493 = vmatpush3.bf16.msra.mxu0 %v552_v3 }
   0xb   :  { %494 = vmatprep.subr.bf16.mxu0 %v591_v1 }
   0xe   :  { %495 = vmatpush3.bf16.msra.mxu0 %v553_v5 }
   0xf   :  { %496 = vmatprep.subr.bf16.mxu0 %v591_v1 }
  0x10   :  { %12 = vsyncpa [#allocation3], 0  ;;  %vm92_vm2 = vcmask 1041408   ;;  %v593_v8 = vmov 65535   ;;  %v555_v10 = vld [vmem:[%s739_s1 + $0x28] sm:$0xff]   ;;  %v29_v14 = vld [vmem:[%s738_s0] sm:$0xff]  ;;  %v44_v18 = vlaneseq }
  0x11   :  { %v93_v9 = vsel %vm91_vm1, 4294967295, %v593_v8  ;;  %v556_v11 = vld [vmem:[%s739_s1 + $0x30] ss:$0 sps:$4 sm:$0x33]   ;;  %v43_v15 = vpack.c.bf16 %v29_v14, %v29_v14  ;;  %vm87_vm3 = vcmask 809984   ;;  %v560_v17 = vld [vmem:[%s740_s2 + $0x18] sm:$0xff]  }
  0x12   :  { %497 = vmatpush3.bf16.msra.mxu0 %v554_v7  ;;  %v94_v12 = vsel %vm92_vm2, %v93_v9, 0  ;;  %v559_v16 = vld [vmem:[%s740_s2 + $0x10] sm:$0xff]   ;;  %v45_v19 = vshrl.u32 %v44_v18, 7  ;;  %v28_v21 = vld [vmem:[%s744_s6] sm:$0xff]  ;;  %vm177_vm4 = vcmask 523264   ;;  %v562_v32 = vld [vmem:[%s741_s3 + $0x8] sm:$0xff]  }
  0x13   :  { %498 = vmatprep.subr.bf16.mxu0 %v591_v1  ;;  %v96_v13 = vand.u32 %v556_v11, %v94_v12  ;;  %511 = vmatpush3.bf16.msra.mxu1 %v559_v16  ;;  %v561_v30 = vld [vmem:[%s741_s3] sm:$0xff]   ;;  %v563_v33 = vld [vmem:[%s741_s3 + $0x10] sm:$0xff]   ;;  %v564_v34 = vld [vmem:[%s741_s3 + $0x18] sm:$0xff]   ;;  %vm326_vm5 = vcmask 261120   ;;  %v594_v57 = vmov 0   ;;  %vm380_vm6 = vcmask 130048  }
  0x14   :  { %512 = vmatprep.subr.bf16.mxu1 %v591_v1  ;;  %v46_v20 = vsub.s32 0, %v45_v19  ;;  %v151_v35 = vsub.s32 1, %v45_v19  ;;  %v565_v45 = vld [vmem:[%s742_s4] sm:$0xff]   ;;  %v566_v46 = vld [vmem:[%s742_s4 + $0x8] sm:$0xff]   ;;  %v234_v47 = vsub.s32 2, %v45_v19  ;;  %549 = vset.pattern.permute.xlu0 %v594_v57  ;;  %v312_v58 = vsub.s32 3, %v45_v19 }
  0x15   :  { %376 = vperm.xlu0 %549, %v28_v21   ;;  %v372_v5 = vld [vmem:[%s743_s5] sm:$0x1]  ;;  %s595_s12 = smov [#allocation2]   ;;  %vm427_vm7 = vcmask 57344  }
  0x16   :  { %499 = vmatpush3.bf16.msra.mxu0 %v555_v10  ;;  %v47_v22 = vrot.slane %v28_v21, %v46_v20  ;;  %v152_v36 = vrot.slane %v28_v21, %v151_v35  ;;  %v235_v48 = vrot.slane %v28_v21, %v234_v47  ;;  %v313_v59 = vrot.slane %v28_v21, %v312_v58  ;;  %s435_s13 = sshll.u32 %s595_s12, 4  ;;  %s436_s13 = int_to_ptr.vmem [resolvable:$true] %s435_s13 }
  0x17   :  { %500 = vmatprep.subr.bf16.mxu0 %v591_v1  ;;  %513 = vmatpush3.bf16.msra.mxu1 %v560_v17  ;;  %s567_s14 = scalar_lea.vmem %s436_s13, 16  ;;  %s571_s15 = scalar_lea.vmem %s436_s13, 32 }
  0x18   :  { %518 = vmatprep.subr.bf16.mxu1 %v591_v1  ;;  %p568_p0 = scmp.ne.s32.totalorder %s436_s13, %s567_s14  ;;  %p572_p1 = scmp.lt.s32.totalorder %s436_s13, %s436_s13 }
  0x19   :  { %p573_p2 = scmp.lt.s32.totalorder %s571_s15, %s567_s14 }
  0x1a   :  { %501 = vmatpush3.bf16.msra.mxu0 %v96_v13 }
  0x1b   :  { %530 = vmatprep.subr.bf16.mxu0 %v591_v1  ;;  %p574_p3 = por %p573_p2, %p572_p1 }
  0x1d   :  { %503 = vmatmul.mubr.msk.bf16.vlgmr.msra.gmra.mrb[0].mxu0 %vm87_vm3, %v43_v15  ;;  %p575_p4 = pnand %p574_p3, %p568_p0 }
  0x1e   :  { %534 = vmatprep.mubr.msk.bf16.mxu0 %vm592_vm0, %v591_v1  ;;  %531 = vmatpush3.bf16.msra.mxu0 %v565_v45 }
  0x1f   :  { %532 = vmatprep.subr.bf16.mxu0 %v591_v1 }
  0x22   :  { %533 = vmatpush3.bf16.msra.mxu0 %v566_v46 }
  0x94   :  { %v377_v6 = vpop.permute.xlu0 %376 }
  0x95   :  { %v378_v7 = vrot.slane %v377_v6, 4 }
  0xf0   :  { %v132_v23 = vpop.f32.mrb[0].mxu0 }
  0xf1   :  { %v133_v24 = vadd.f32 %v132_v23, %v47_v22  ;;  %v504_v25 = vpop.f32.mrb[1].mxu0 }
  0xf2   :  { %v135_v26 = vpop.f32.mrb[2].mxu0 }
  0xf3   :  { %v138_v27 = vmul.f32 0.2, %v133_v24  ;;  %v505_v28 = vpop.f32.mrb[3].mxu0 }
  0xf5   :  { %v139_v29 = vmax.f32 %v133_v24, %v138_v27 }
  0xf7   :  { %v148_v31 = vpack.c.bf16 %v139_v29, %v139_v29 }
  0xf9   :  { %515 = vmatmul.mubr.msk.bf16.vlgmr.msra.gmra.mrb[0].mxu1 %vm177_vm4, %v148_v31 }
  0xfa   :  { %519 = vmatpush3.bf16.msra.mxu1 %v561_v30  ;;  %526 = vmatprep.mubr.msk.bf16.mxu1 %vm592_vm0, %v591_v1 }
  0xfb   :  { %520 = vmatprep.subr.bf16.mxu1 %v591_v1 }
  0xfe   :  { %521 = vmatpush3.bf16.msra.mxu1 %v562_v32 }
  0xff   :  { %522 = vmatprep.subr.bf16.mxu1 %v591_v1 }
 0x102   :  { %523 = vmatpush3.bf16.msra.mxu1 %v563_v33 }
 0x103   :  { %524 = vmatprep.subr.bf16.mxu1 %v591_v1 }
 0x106   :  { %525 = vmatpush3.bf16.msra.mxu1 %v564_v34 }
 0x107   :  { %538 = vmatprep.subr.bf16.mxu1 %v591_v1 }
 0x1cc   :  { %v215_v37 = vpop.f32.mrb[0].mxu1 }
 0x1cd   :  { %v216_v38 = vadd.f32 %v215_v37, %v152_v36  ;;  %v516_v39 = vpop.f32.mrb[1].mxu1 }
 0x1ce   :  { %v218_v40 = vpop.f32.mrb[2].mxu1 }
 0x1cf   :  { %v221_v41 = vmul.f32 0.2, %v216_v38  ;;  %v517_v42 = vpop.f32.mrb[3].mxu1 }
 0x1d1   :  { %v222_v43 = vmax.f32 %v216_v38, %v221_v41 }
 0x1d3   :  { %v231_v44 = vpack.c.bf16 %v222_v43, %v222_v43 }
 0x1d5   :  { %527 = vmatmul.mubr.msk.bf16.vlgmr.msra.gmra.mrb[4].mxu1 %vm177_vm4, %v231_v44 }
 0x1d6   :  { %540 = vmatprep.mubr.msk.bf16.mxu1 %vm592_vm0, %v591_v1 }
 0x2a8   :  { %v297_v49 = vpop.f32.mrb[4].mxu1 }
 0x2a9   :  { %v298_v50 = vadd.f32 %v297_v49, %v235_v48  ;;  %v528_v51 = vpop.f32.mrb[5].mxu1 }
 0x2aa   :  { %v300_v52 = vpop.f32.mrb[6].mxu1 }
 0x2ab   :  { %v303_v53 = vmul.f32 0.2, %v298_v50  ;;  %v529_v54 = vpop.f32.mrb[7].mxu1 }
 0x2ad   :  { %v304_v55 = vmax.f32 %v298_v50, %v303_v53 }
 0x2af   :  { %v309_v56 = vpack.c.bf16 %v304_v55, %v304_v55 }
 0x2b1   :  { %535 = vmatmul.mubr.msk.bf16.vlgmr.msra.gmra.mrb[4].mxu0 %vm326_vm5, %v309_v56 }
 0x384   :  { %v364_v60 = vpop.f32.mrb[4].mxu0 }
 0x385   :  { %v365_v61 = vadd.f32 %v364_v60, %v313_v59  ;;  %v536_v62 = vpop.f32.mrb[5].mxu0 }
 0x386   :  { %v367_v63 = vpop.f32.mrb[6].mxu0 }
 0x387   :  { %v370_v0 = vmul.f32 0.2, %v365_v61  ;;  %v537_v1 = vpop.f32.mrb[7].mxu0 }
 0x389   :  { %v371_v2 = vmax.f32 %v365_v61, %v370_v0 }
 0x38b   :  { %v373_v3 = vpack.c.bf16 %v371_v2, %v371_v2 }
 0x38d   :  { %v385_v4 = vsel %vm380_vm6, %v373_v3, 0 }
 0x38e   :  { %539 = vmatpush3.bf16.xpose.msra.mxu1 %v385_v4 }
 0x395   :  { %541 = vmatmul.mubr.msk.bf16.vlgmr.msra.gmra.mrb[8].mxu1 %vm380_vm6, %v372_v5 }
 0x468   :  { %v421_v8 = vpop.f32.mrb[8].mxu1 }
 0x469   :  { %v422_v9 = vadd.f32 %v421_v8, %v378_v7  ;;  %v542_v10 = vpop.f32.mrb[9].mxu1 }
 0x46a   :  { %v424_v11 = vpop.f32.mrb[10].mxu1 }
 0x46b   :  { %v543_v12 = vpop.f32.mrb[11].mxu1  ;;  %428 = vst.msk [vmem:[#allocation2] sm:$0x1] %vm427_vm7, %v422_v9 }
 0x46c   :  { %578 = shalt.err (!%p575_p4)
}
 0x46d   :  { %s579_s17 = scalar_lea.hbm %s745_s7, 16 }
 0x46e   :  { %p580_p5 = scmp.ne.s32.totalorder %s745_s7, %s579_s17  ;;  %p583_p6 = scmp.lt.u32.totalorder %s579_s17, %s745_s7 }
 0x470   :  { %p585_p7 = pnand %p583_p6, %p580_p5 }
 0x472   :  { %588 = shalt.err (!%p585_p7)
}
 0x473   :  { %438 = dma.vmem_to_hbm [thread:$0]  %s436_s13, 16, %s745_s7, [#allocation3]  }
 0x474   :  { %589 = dma.done.wait [#allocation3], 16  }
 0x475   :  { %590 = vsyncadd [#allocation3], 4294967280 }
 0x476   :  { %442 = vsyncpa [#allocation3], 1 }

</bundles_post_ra>
